<compile_context>
chip_gen: v7x
topology: tpu7x:2x2x1
jax: 0.10.0
libtpu: 0.0.40
codegen_flags: <defaults>
</compile_context>

<pallas_src>
import jax
import jax.numpy as jnp
from jax.experimental import pallas as pl
from jax.experimental.pallas import tpu as pltpu


_SUBLANE = 16          # bf16 packs 16 rows per sublane tile
_LANES = 128


def _round_up(x, m):
    return (x + m - 1) // m * m


def _bbox_pred_kernel(x_ref, w_ref, b_ref, out_ref):
    """Fused (pool+)Linear + folded-BN on one batch tile.

    x_ref: (blk, K) bf16   w_ref: (K, D) bf16   b_ref: (1, D) f32
    out_ref: (blk, D) f32
    """
    acc = jnp.dot(x_ref[...], w_ref[...], preferred_element_type=jnp.float32)  # MXU, f32 acc
    out_ref[...] = (acc + b_ref[...]).astype(out_ref.dtype)                    # BN shift in f32


def _hw_info():
    """(per-core VMEM bytes, # TensorCores). Conservative fallbacks if query fails."""
    vmem_bytes = 64 << 20          # v7x per-core VMEM; safe lower bound everywhere
    num_tc = 1
    try:
        vmem_bytes = int(pltpu.get_tpu_info().vmem_capacity_bytes)
    except Exception:
        pass
    try:
        kind = jax.devices()[0].device_kind.lower()
        if "v7" in kind:           # v7x: 2 TensorCores per chip
            num_tc = 2
    except Exception:
        pass
    return vmem_bytes, num_tc


def _pick_block_b(B, K, requested, num_tc, per_buf_budget, x_itemsize):
    """Batch-tile rows: multiple of 16 (bf16 packing) or the full batch dim."""
    requested = max(_SUBLANE, requested // _SUBLANE * _SUBLANE)
    # Per buffered row we hold one x row (streamed) and one f32 output row.
    row_bytes = K * x_itemsize + _round_up(1, 1) * _LANES * 4
    cap = max(_SUBLANE, (per_buf_budget // row_bytes) // _SUBLANE * _SUBLANE)
    blk = min(requested, cap)
    if num_tc > 1:
        # >= 2 grid steps per TensorCore: both cores get work AND keep
        # prefetch/compute overlap (a single step per core exposes the full DMA).
        blk = min(blk, max(_SUBLANE, _round_up(pl.cdiv(B, 2 * num_tc), _SUBLANE)))
    if blk >= B:
        # Single maximal tile covering the whole batch (full-dim layout exception),
        # the preferred choice on single-TensorCore v5e / v6e.
        return B
    return blk


def _vmem_limit_bytes(blk, K, D, x_itemsize, vmem_capacity):
    x_buf = 2 * blk * _round_up(K, _LANES) * x_itemsize            # double-buffered x tiles
    w_buf = _round_up(K, _SUBLANE) * _round_up(D, _LANES) * 2      # resident bf16 weight
    b_buf = 8 * _LANES * 4                                         # resident f32 bias tile
    o_buf = 2 * blk * _round_up(D, _LANES) * 4                     # double-buffered f32 out tiles
    need = x_buf + w_buf + b_buf + o_buf + (4 << 20)               # + Mosaic internal scratch slack
    return int(min(max(need, 32 << 20), int(vmem_capacity * 0.9)))


def bbox_regressor_forward(x, w_fused, b_fused, *, block_b=4096,
                           x_stream_dtype=jnp.bfloat16):
    """BBoxRegressor forward (eval-mode BN folded).

    x:       (B, C) or (B, C, H, W) float features.
    w_fused: (C, D) float -- Linear.weight^T with the eval-mode BN scale folded in.
    b_fused: (D,) or (1, D) float -- Linear.bias + BN shift folded in.
    Returns  (B, D) float32 bbox deltas, D = 4 * num_classes.
    """
    w_eff = w_fused.astype(jnp.float32)
    if x.ndim == 4:
        B, C, H, W = x.shape
        hw = H * W
        x2 = x.reshape(B, C * hw)                 # free for contiguous NCHW
        if hw > 1:
            # Fold adaptive_avg_pool2d(output_size=1) into the matmul weight.
            w_eff = jnp.repeat(w_eff, hw, axis=0) * (1.0 / hw)
    else:
        x2 = x.reshape(x.shape[0], -1)            # flatten(start_dim=1)
    B, K = x2.shape
    D = w_eff.shape[1]

    # Stream activations narrow (kernel is HBM-read bound on x); f32 accumulation
    # happens on the MXU.  Pass x_stream_dtype=jnp.float32 if delta precision matters.
    x2 = x2.astype(x_stream_dtype)
    w_eff = w_eff.astype(jnp.bfloat16)
    b_eff = jnp.asarray(b_fused, jnp.float32).reshape(1, D)

    vmem_cap, num_tc = _hw_info()
    per_buf_budget = min(16 << 20, vmem_cap // 4)     # 16 MiB cap (v7x-safe), less on small VMEM
    itemsize = jnp.dtype(x_stream_dtype).itemsize
    blk = _pick_block_b(B, K, block_b, num_tc, per_buf_budget, itemsize)

    out = pl.pallas_call(
        _bbox_pred_kernel,
        out_shape=jax.ShapeDtypeStruct((B, D), jnp.float32),
        grid=(pl.cdiv(B, blk),),                   # masked boundary block; no jnp.pad copy
        in_specs=[
            pl.BlockSpec((blk, K), lambda i: (i, 0)),   # streamed batch tile (auto double-buffered)
            pl.BlockSpec((K, D), lambda i: (0, 0)),     # resident fused weight (bf16)
            pl.BlockSpec((1, D), lambda i: (0, 0)),     # resident fused bias / BN shift (f32)
        ],
        out_specs=pl.BlockSpec((blk, D), lambda i: (i, 0)),
        compiler_params=pltpu.CompilerParams(
            dimension_semantics=("parallel",),
            vmem_limit_bytes=_vmem_limit_bytes(blk, K, D, itemsize, vmem_cap),
        ),
    )(x2, w_eff, b_eff)
    return out


if __name__ == "__main__":
    # Small, module-consistent shapes.  B is intentionally not a multiple of the
    # 16-row bf16 tile so the masked-boundary-block path is exercised on multi-core parts.
    B = 20
    in_channels = 128
    H = W = 3
    num_classes = 2
    D = 4 * num_classes            # = 8 bbox-delta outputs
    eps = 1e-5

    key = jax.random.PRNGKey(0)
    k = jax.random.split(key, 3)

    # --- deterministic parameters mirroring BBoxRegressor.__init__ (bn_neck=True) ---
    W_lin = 0.01 * jax.random.normal(k[0], (D, in_channels), jnp.float32)  # Linear.weight (out,in)
    lb = jnp.zeros((D,), jnp.float32)                                      # Linear.bias = 0
    gamma = 0.01 * jax.random.normal(k[1], (D,), jnp.float32)              # BN.weight ~ N(0, .01)
    beta = jnp.zeros((D,), jnp.float32)                                    # BN.bias = 0
    rmean = jnp.zeros((D,), jnp.float32)                                   # eval-mode running stats
    rvar = jnp.ones((D,), jnp.float32)

    scale = gamma / jnp.sqrt(rvar + eps)
    w_fused = W_lin.T * scale[None, :]                  # (C, D): Linear^T with BN scale folded
    b_fused = ((lb - rmean) * scale + beta)[None, :]    # (1, D): bias + BN shift folded

    # 4D NCHW input with spatial != 1x1 -> exercises the pool-folded-into-matmul path.
    x = jax.random.normal(k[2], (B, in_channels, H, W), jnp.float32)

    deltas = bbox_regressor_forward(x, w_fused, b_fused)
    jax.block_until_ready(deltas)

    # Full-precision f32 reference of the PyTorch forward: pool -> Linear -> eval BN.
    x_pooled = jnp.mean(x, axis=(2, 3))
    ref = ((x_pooled @ W_lin.T + lb) - rmean) * scale + beta

    assert deltas.shape == (B, D)
    err = float(jnp.max(jnp.abs(deltas - ref)))
    assert jnp.allclose(deltas, ref, rtol=3e-2, atol=2e-3), err
    print("KERNEL_OK")
</pallas_src>

<mosaic_0001>
module attributes {stable_mosaic.version = 11 : i64} {
  func.func @_bbox_pred_kernel(%arg0: i32, %arg1: memref<20x1152xbf16, #tpu.memory_space<vmem>>, %arg2: memref<1152x8xbf16, #tpu.memory_space<vmem>>, %arg3: memref<1x8xf32, #tpu.memory_space<vmem>>, %arg4: memref<20x8xf32, #tpu.memory_space<vmem>>) attributes {dimension_semantics = [#tpu.dimension_semantics<parallel>], iteration_bounds = array<i64: 1>, scalar_prefetch = 0 : i64, scratch_operands = 0 : i64, tpu.core_type = #tpu.core_type<tc>, window_params = [{transform_indices = @transform_0, window_bounds = array<i64: 20, 1152>}, {pipeline_mode = #tpu.pipeline_mode<synchronous>, transform_indices = @transform_1, window_bounds = array<i64: 1152, 8>}, {pipeline_mode = #tpu.pipeline_mode<synchronous>, transform_indices = @transform_2, window_bounds = array<i64: 1, 8>}, {transform_indices = @transform_3, window_bounds = array<i64: 20, 8>}]} {
    %c0 = arith.constant 0 : index
    %c0_0 = arith.constant 0 : index
    %0 = vector.load %arg1[%c0, %c0_0] : memref<20x1152xbf16, #tpu.memory_space<vmem>>, vector<20x1152xbf16>
    %c0_1 = arith.constant 0 : index
    %c0_2 = arith.constant 0 : index
    %1 = vector.load %arg2[%c0_1, %c0_2] : memref<1152x8xbf16, #tpu.memory_space<vmem>>, vector<1152x8xbf16>
    %cst = arith.constant dense<0.000000e+00> : vector<20x8xf32>
    %2 = tpu.matmul %0, %1, %cst {dimension_numbers = #tpu.dot_dimension_numbers<[1], [0], [0], [1], [0, 0, 1, 1], [], []>} : vector<20x1152xbf16>, vector<1152x8xbf16>, vector<20x8xf32> -> vector<20x8xf32>
    %c0_3 = arith.constant 0 : index
    %c0_4 = arith.constant 0 : index
    %3 = vector.load %arg3[%c0_3, %c0_4] : memref<1x8xf32, #tpu.memory_space<vmem>>, vector<1x8xf32>
    %4 = vector.broadcast %3 : vector<1x8xf32> to vector<20x8xf32>
    %5 = arith.addf %2, %4 : vector<20x8xf32>
    %c0_5 = arith.constant 0 : index
    %c0_6 = arith.constant 0 : index
    %6 = vector.load %arg4[%c0_5, %c0_6] : memref<20x8xf32, #tpu.memory_space<vmem>>, vector<20x8xf32>
    tpu.vector_store %arg4[%c0_5, %c0_6], %5 {strides = array<i32>} : memref<20x8xf32, #tpu.memory_space<vmem>>, vector<20x8xf32>,
    return
  }
  func.func @transform_0(%arg0: i32) -> (i32, i32) {
    %c0_i32 = arith.constant 0 : i32
    %c0_i32_0 = arith.constant 0 : i32
    return %arg0, %c0_i32 : i32, i32
  }
  func.func @transform_1(%arg0: i32) -> (i32, i32) {
    %c0_i32 = arith.constant 0 : i32
    %c0_i32_0 = arith.constant 0 : i32
    %c0_i32_1 = arith.constant 0 : i32
    return %c0_i32, %c0_i32_0 : i32, i32
  }
  func.func @transform_2(%arg0: i32) -> (i32, i32) {
    %c0_i32 = arith.constant 0 : i32
    %c0_i32_0 = arith.constant 0 : i32
    %c0_i32_1 = arith.constant 0 : i32
    return %c0_i32, %c0_i32_0 : i32, i32
  }
  func.func @transform_3(%arg0: i32) -> (i32, i32) {
    %c0_i32 = arith.constant 0 : i32
    %c0_i32_0 = arith.constant 0 : i32
    return %arg0, %c0_i32 : i32, i32
  }
}

</mosaic_0001>

<bundles_post_ra>
// kernel: tpu_custom_call.1
= control target key start
LH: loop header
LB: loop body
LE: loop exit
PB: predicated region body
PF: predicated region fallthrough
CT: control target
= control target key end

     0   :  { %vm934_vm0 = vcmask 60416   ;;  %vm931_vm1 = vcmask 64512   ;;  %s1557_s1 = inlined_call_operand.vmem [shape: bf16[1152,8], index: 1, kind: input, shape index: {}]   ;;  %s1558_s0 = inlined_call_operand.vmem [shape: bf16[20,1152], index: 0, kind: input, shape index: {}]   ;;  %s1559_s2 = inlined_call_operand.vmem [shape: f32[1,8], index: 2, kind: input, shape index: {}]   ;;  %s1560_s3 = inlined_call_operand.vmem [shape: f32[20,8], index: 3, kind: output, shape index: {}]  }
   0x1   :  { %v1173_v0 = vld [vmem:[%s1557_s1 + $0x40] sm:$0xff]   ;;  %v1177_v4 = vld [vmem:[%s1557_s1 + $0x48] sm:$0xff]   ;;  %v1181_v8 = vld [vmem:[%s1557_s1 + $0x50] sm:$0xff]  }
   0x2   :  { %v1174_v1 = vld [vmem:[%s1557_s1] sm:$0xff]   ;;  %1031 = vmatprep.subr.bf16.mxu0 %v1173_v0  ;;  %v1178_v5 = vld [vmem:[%s1557_s1 + $0x8] sm:$0xff]   ;;  %v1182_v9 = vld [vmem:[%s1557_s1 + $0x10] sm:$0xff]  }
   0x3   :  { %v1175_v2 = vld [vmem:[%s1557_s1 + $0xc0] sm:$0xff]   ;;  %1032 = vmatpush3.bf16.msra.mxu0 %v1174_v1  ;;  %v1179_v6 = vld [vmem:[%s1557_s1 + $0xc8] sm:$0xff]   ;;  %v1183_v10 = vld [vmem:[%s1557_s1 + $0xd0] sm:$0xff]  }
   0x4   :  { %v1176_v3 = vld [vmem:[%s1557_s1 + $0x80] sm:$0xff]   ;;  %1059 = vmatprep.subr.bf16.mxu1 %v1175_v2  ;;  %1033 = vmatprep.subr.bf16.mxu0 %v1177_v4  ;;  %v1180_v7 = vld [vmem:[%s1557_s1 + $0x88] sm:$0xff]   ;;  %v1184_v11 = vld [vmem:[%s1557_s1 + $0x90] sm:$0xff]  }
   0x5   :  { %1060 = vmatpush3.bf16.msra.mxu1 %v1176_v3  ;;  %v1185_v12 = vld [vmem:[%s1557_s1 + $0x58] sm:$0xff]   ;;  %v1189_v16 = vld [vmem:[%s1557_s1 + $0x60] sm:$0xff]   ;;  %v1193_v20 = vld [vmem:[%s1557_s1 + $0x68] sm:$0xff]  }
   0x6   :  { %1061 = vmatprep.subr.bf16.mxu1 %v1179_v6  ;;  %v1186_v13 = vld [vmem:[%s1557_s1 + $0x18] sm:$0xff]   ;;  %v1190_v17 = vld [vmem:[%s1557_s1 + $0x20] sm:$0xff]   ;;  %v1194_v21 = vld [vmem:[%s1557_s1 + $0x28] sm:$0xff]  }
   0x7   :  { %1034 = vmatpush3.bf16.msra.mxu0 %v1178_v5  ;;  %v1187_v14 = vld [vmem:[%s1557_s1 + $0xd8] sm:$0xff]   ;;  %v1191_v18 = vld [vmem:[%s1557_s1 + $0xe0] sm:$0xff]   ;;  %v1195_v22 = vld [vmem:[%s1557_s1 + $0xe8] sm:$0xff]  }
   0x8   :  { %1035 = vmatprep.subr.bf16.mxu0 %v1181_v8  ;;  %v1188_v15 = vld [vmem:[%s1557_s1 + $0x98] sm:$0xff]   ;;  %v1192_v19 = vld [vmem:[%s1557_s1 + $0xa0] sm:$0xff]   ;;  %v1196_v23 = vld [vmem:[%s1557_s1 + $0xa8] sm:$0xff]  }
   0x9   :  { %1062 = vmatpush3.bf16.msra.mxu1 %v1180_v7  ;;  %v1197_v24 = vld [vmem:[%s1557_s1 + $0x70] sm:$0xff]   ;;  %v1201_v28 = vld [vmem:[%s1557_s1 + $0x78] sm:$0xff]   ;;  %v1204_v31 = vld [vmem:[%s1558_s0] ss:$36 sps:$4 sm:$0xff]  }
   0xa   :  { %1063 = vmatprep.subr.bf16.mxu1 %v1183_v10  ;;  %v1198_v25 = vld [vmem:[%s1557_s1 + $0x30] sm:$0xff]   ;;  %v1202_v29 = vld [vmem:[%s1557_s1 + $0x38] sm:$0xff]   ;;  %v1206_v32 = vld [vmem:[%s1558_s0 + $0x4] ss:$36 sps:$4 sm:$0xff]  }
   0xb   :  { %1036 = vmatpush3.bf16.msra.mxu0 %v1182_v9  ;;  %v1199_v26 = vld [vmem:[%s1557_s1 + $0xf0] sm:$0xff]   ;;  %v1203_v30 = vld [vmem:[%s1557_s1 + $0xf8] sm:$0xff]   ;;  %723 = vmatprep.mubr.bf16.mxu0 %v1206_v32  ;;  %v1208_v34 = vld [vmem:[%s1557_s1 + $0x140] sm:$0xff]  }
   0xc   :  { %1037 = vmatprep.subr.bf16.mxu0 %v1185_v12  ;;  %v1200_v27 = vld [vmem:[%s1557_s1 + $0xb0] sm:$0xff]   ;;  %v1207_v33 = vld [vmem:[%s1557_s1 + $0xb8] sm:$0xff]   ;;  %v1209_v35 = vld [vmem:[%s1558_s0 + $0x8] ss:$36 sps:$4 sm:$0xff]  }
   0xd   :  { %1064 = vmatpush3.bf16.msra.mxu1 %v1184_v11  ;;  %v1211_v36 = vld [vmem:[%s1558_s0 + $0xc] ss:$36 sps:$4 sm:$0xff]   ;;  %v1212_v37 = vld [vmem:[%s1557_s1 + $0x100] sm:$0xff]   ;;  %v1223_v48 = vld [vmem:[%s1557_s1 + $0x158] sm:$0xff]  }
   0xe   :  { %1065 = vmatprep.subr.bf16.mxu1 %v1187_v14  ;;  %771 = vmatprep.mubr.bf16.mxu1 %v1211_v36  ;;  %v1213_v38 = vld [vmem:[%s1557_s1 + $0x1c0] sm:$0xff]   ;;  %v1215_v40 = vld [vmem:[%s1557_s1 + $0x148] sm:$0xff]   ;;  %v1219_v44 = vld [vmem:[%s1557_s1 + $0x150] sm:$0xff]  }
   0xf   :  { %1038 = vmatpush3.bf16.msra.mxu0 %v1186_v13  ;;  %v1214_v39 = vld [vmem:[%s1557_s1 + $0x180] sm:$0xff]   ;;  %v1216_v41 = vld [vmem:[%s1557_s1 + $0x108] sm:$0xff]   ;;  %v1220_v45 = vld [vmem:[%s1557_s1 + $0x110] sm:$0xff]  }
  0x10   :  { %1039 = vmatprep.subr.bf16.mxu0 %v1189_v16  ;;  %v1217_v42 = vld [vmem:[%s1557_s1 + $0x1c8] sm:$0xff]   ;;  %v1221_v46 = vld [vmem:[%s1557_s1 + $0x1d0] sm:$0xff]   ;;  %v1224_v49 = vld [vmem:[%s1557_s1 + $0x118] sm:$0xff]  }
  0x11   :  { %1066 = vmatpush3.bf16.msra.mxu1 %v1188_v15  ;;  %v1218_v43 = vld [vmem:[%s1557_s1 + $0x188] sm:$0xff]   ;;  %v1222_v47 = vld [vmem:[%s1557_s1 + $0x190] sm:$0xff]   ;;  %v1225_v50 = vld [vmem:[%s1557_s1 + $0x1d8] sm:$0xff]  }
  0x12   :  { %1067 = vmatprep.subr.bf16.mxu1 %v1191_v18  ;;  %v1226_v51 = vld [vmem:[%s1557_s1 + $0x198] sm:$0xff]   ;;  %v1227_v52 = vld [vmem:[%s1557_s1 + $0x160] sm:$0xff]   ;;  %v1231_v56 = vld [vmem:[%s1557_s1 + $0x168] sm:$0xff]  }
  0x13   :  { %1040 = vmatpush3.bf16.msra.mxu0 %v1190_v17  ;;  %v1228_v53 = vld [vmem:[%s1557_s1 + $0x120] sm:$0xff]   ;;  %v25_v57 = vld [vmem:[%s1558_s0 + $0x48] sm:$0x33]  ;;  %v1237_v63 = vld [vmem:[%s1557_s1 + $0x170] sm:$0xff]  }
  0x14   :  { %1041 = vmatprep.subr.bf16.mxu0 %v1193_v20  ;;  %v1229_v54 = vld [vmem:[%s1557_s1 + $0x1e0] sm:$0xff]   ;;  %v951_v58 = vcombine.high %v25_v57, %v25_v57  ;;  %v1233_v59 = vld [vmem:[%s1557_s1 + $0x128] sm:$0xff]   ;;  %v950_v60 = vcombine.low %v25_v57, %v25_v57  ;;  %v26_v0 = vld [vmem:[%s1558_s0 + $0x50] sm:$0x33] }
  0x15   :  { %1068 = vmatpush3.bf16.msra.mxu1 %v1192_v19  ;;  %v1230_v55 = vld [vmem:[%s1557_s1 + $0x1a0] sm:$0xff]   ;;  %v1235_v61 = vld [vmem:[%s1557_s1 + $0x1e8] sm:$0xff]   ;;  %v953_v1 = vcombine.high %v26_v0, %v26_v0  ;;  %v1239_v2 = vld [vmem:[%s1557_s1 + $0x130] sm:$0xff]   ;;  %v952_v3 = vcombine.low %v26_v0, %v26_v0 }
  0x16   :  { %1069 = vmatprep.subr.bf16.mxu1 %v1195_v22  ;;  %v1236_v62 = vld [vmem:[%s1557_s1 + $0x1a8] sm:$0xff]   ;;  %v1241_v4 = vld [vmem:[%s1557_s1 + $0x1f0] sm:$0xff]   ;;  %v1243_v6 = vld [vmem:[%s1557_s1 + $0x178] sm:$0xff]  }
  0x17   :  { %1042 = vmatpush3.bf16.msra.mxu0 %v1194_v21  ;;  %v1242_v5 = vld [vmem:[%s1557_s1 + $0x1b0] sm:$0xff]   ;;  %v1244_v7 = vld [vmem:[%s1557_s1 + $0x138] sm:$0xff]   ;;  %v1250_v12 = vld [vmem:[%s1557_s1 + $0x200] sm:$0xff]  }
  0x18   :  { %1043 = vmatprep.subr.bf16.mxu0 %v1197_v24  ;;  %v1245_v8 = vld [vmem:[%s1557_s1 + $0x1f8] sm:$0xff]   ;;  %v1246_v9 = vld [vmem:[%s1558_s0 + $0x10] ss:$36 sps:$4 sm:$0xff]   ;;  %v1254_v15 = vld [vmem:[%s1557_s1 + $0x208] sm:$0xff]  }
  0x19   :  { %1070 = vmatpush3.bf16.msra.mxu1 %v1196_v23  ;;  %v1248_v10 = vld [vmem:[%s1558_s0 + $0x14] ss:$36 sps:$4 sm:$0xff]   ;;  %v1253_v14 = vld [vmem:[%s1558_s0 + $0x1c] ss:$36 sps:$4 sm:$0xff]  }
  0x1a   :  { %1071 = vmatprep.subr.bf16.mxu1 %v1199_v26  ;;  %v1249_v11 = vld [vmem:[%s1557_s1 + $0x1b8] sm:$0xff]   ;;  %v1257_v18 = vld [vmem:[%s1557_s1 + $0x210] sm:$0xff]   ;;  %v28_v19 = vld [vmem:[%s1558_s0 + $0x60] sm:$0x33] }
  0x1b   :  { %1044 = vmatpush3.bf16.msra.mxu0 %v1198_v25  ;;  %v1251_v13 = vld [vmem:[%s1558_s0 + $0x18] ss:$36 sps:$4 sm:$0xff]   ;;  %v957_v21 = vcombine.high %v28_v19, %v28_v19  ;;  %v956_v22 = vcombine.low %v28_v19, %v28_v19  ;;  %v1265_v24 = vld [vmem:[%s1558_s0 + $0x20] ss:$36 sps:$4 sm:$0xff]   ;;  %v1262_v26 = vld [vmem:[%s1557_s1 + $0x228] sm:$0xff]  }
  0x1c   :  { %1045 = vmatprep.subr.bf16.mxu0 %v1201_v28  ;;  %v27_v16 = vld [vmem:[%s1558_s0 + $0x58] sm:$0x33]  ;;  %v1261_v25 = vld [vmem:[%s1557_s1 + $0x220] sm:$0xff]  }
  0x1d   :  { %1072 = vmatpush3.bf16.msra.mxu1 %v1200_v27  ;;  %v955_v17 = vcombine.high %v27_v16, %v27_v16  ;;  %v954_v20 = vcombine.low %v27_v16, %v27_v16  ;;  %v1260_v23 = vld [vmem:[%s1557_s1 + $0x218] sm:$0xff]   ;;  %v1263_v27 = vld [vmem:[%s1557_s1 + $0x230] sm:$0xff]  }
  0x1e   :  { %1073 = vmatprep.subr.bf16.mxu1 %v1203_v30  ;;  %v1264_v28 = vld [vmem:[%s1557_s1 + $0x238] sm:$0xff]  }
  0x1f   :  { %1046 = vmatpush3.bf16.msra.mxu0 %v1202_v29  ;;  %v1266_v29 = vld [vmem:[%s1558_s0 + $0x68] ss:$0 sps:$4 sm:$0x33]  }
  0x20   :  { %1087 = vmatprep.subr.bf16.mxu0 %v1208_v34 }
  0x21   :  { %1074 = vmatpush3.bf16.msra.mxu1 %v1207_v33 }
  0x22   :  { %724 = vmatmul.mubr.bf16.vlgmr.msra.gmra.mrb[0].mxu0 %v1204_v31  ;;  %1115 = vmatprep.subr.bf16.mxu1 %v1213_v38  ;;  %v940_v31 = vld [vmem:[%s1559_s2] ss:$0 sm:$0xff] }
  0x23   :  { %1088 = vmatpush3.bf16.msra.mxu0 %v1212_v37  ;;  %731 = vmatprep.mubr.bf16.mxu0 %v951_v58 }
  0x24   :  { %772 = vmatmul.mubr.bf16.vlgmr.msra.gmra.mrb[0].mxu1 %v1209_v35  ;;  %1089 = vmatprep.subr.bf16.mxu0 %v1215_v40 }
  0x25   :  { %1116 = vmatpush3.bf16.msra.mxu1 %v1214_v39  ;;  %779 = vmatprep.mubr.bf16.mxu1 %v953_v1 }
  0x26   :  { %1117 = vmatprep.subr.bf16.mxu1 %v1217_v42 }
  0x27   :  { %1090 = vmatpush3.bf16.msra.mxu0 %v1216_v41 }
  0x28   :  { %1091 = vmatprep.subr.bf16.mxu0 %v1219_v44 }
  0x29   :  { %1118 = vmatpush3.bf16.msra.mxu1 %v1218_v43 }
  0x2a   :  { %1119 = vmatprep.subr.bf16.mxu1 %v1221_v46  ;;  %732 = vmatmul.mubr.bf16.gmra.mrb[4].mxu0 %v950_v60 }
  0x2b   :  { %1092 = vmatpush3.bf16.msra.mxu0 %v1220_v45  ;;  %819 = vmatprep.mubr.bf16.mxu0 %v1248_v10 }
  0x2c   :  { %1093 = vmatprep.subr.bf16.mxu0 %v1223_v48  ;;  %780 = vmatmul.mubr.bf16.gmra.mrb[4].mxu1 %v952_v3 }
  0x2d   :  { %1120 = vmatpush3.bf16.msra.mxu1 %v1222_v47  ;;  %867 = vmatprep.mubr.bf16.mxu1 %v1253_v14 }
  0x2e   :  { %1121 = vmatprep.subr.bf16.mxu1 %v1225_v50 }
  0x2f   :  { %1094 = vmatpush3.bf16.msra.mxu0 %v1224_v49 }
  0x30   :  { %1095 = vmatprep.subr.bf16.mxu0 %v1227_v52 }
  0x31   :  { %1122 = vmatpush3.bf16.msra.mxu1 %v1226_v51 }
  0x32   :  { %1123 = vmatprep.subr.bf16.mxu1 %v1229_v54 }
  0x33   :  { %1096 = vmatpush3.bf16.msra.mxu0 %v1228_v53 }
  0x34   :  { %1097 = vmatprep.subr.bf16.mxu0 %v1231_v56 }
  0x35   :  { %1124 = vmatpush3.bf16.msra.mxu1 %v1230_v55 }
  0x36   :  { %1125 = vmatprep.subr.bf16.mxu1 %v1235_v61 }
  0x37   :  { %1098 = vmatpush3.bf16.msra.mxu0 %v1233_v59 }
  0x38   :  { %1099 = vmatprep.subr.bf16.mxu0 %v1237_v63 }
  0x39   :  { %1126 = vmatpush3.bf16.msra.mxu1 %v1236_v62 }
  0x3a   :  { %1127 = vmatprep.subr.bf16.mxu1 %v1241_v4 }
  0x3b   :  { %1100 = vmatpush3.bf16.msra.mxu0 %v1239_v2 }
  0x3c   :  { %1101 = vmatprep.subr.bf16.mxu0 %v1243_v6 }
  0x3d   :  { %1128 = vmatpush3.bf16.msra.mxu1 %v1242_v5 }
  0x3e   :  { %1129 = vmatprep.subr.bf16.mxu1 %v1245_v8 }
  0x3f   :  { %1102 = vmatpush3.bf16.msra.mxu0 %v1244_v7 }
  0x40   :  { %1153 = vmatprep.subr.bf16.mxu0 %v1250_v12 }
  0x41   :  { %1130 = vmatpush3.bf16.msra.mxu1 %v1249_v11 }
  0x42   :  { %820 = vmatmul.mubr.bf16.vlgmr.msra.gmra.mrb[8].mxu0 %v1246_v9 }
  0x43   :  { %1154 = vmatpush3.bf16.msra.mxu0 %v1250_v12  ;;  %827 = vmatprep.mubr.bf16.mxu0 %v955_v17 }
  0x44   :  { %868 = vmatmul.mubr.bf16.vlgmr.msra.gmra.mrb[8].mxu1 %v1251_v13  ;;  %1155 = vmatprep.subr.bf16.mxu0 %v1254_v15 }
  0x45   :  { %875 = vmatprep.mubr.bf16.mxu1 %v957_v21 }
  0x47   :  { %1156 = vmatpush3.bf16.msra.mxu0 %v1254_v15 }
  0x48   :  { %1157 = vmatprep.subr.bf16.mxu0 %v1257_v18 }
  0x4a   :  { %828 = vmatmul.mubr.bf16.gmra.mrb[12].mxu0 %v954_v20 }
  0x4b   :  { %1158 = vmatpush3.bf16.msra.mxu0 %v1257_v18  ;;  %1169 = vmatprep.mubr.bf16.mxu0 %v1265_v24 }
  0x4c   :  { %876 = vmatmul.mubr.bf16.gmra.mrb[12].mxu1 %v956_v22  ;;  %1159 = vmatprep.subr.bf16.mxu0 %v1260_v23 }
  0x4f   :  { %1160 = vmatpush3.bf16.msra.mxu0 %v1260_v23 }
  0x50   :  { %1161 = vmatprep.subr.bf16.mxu0 %v1261_v25 }
  0x53   :  { %1162 = vmatpush3.bf16.msra.mxu0 %v1261_v25 }
  0x54   :  { %1163 = vmatprep.subr.bf16.mxu0 %v1262_v26 }
  0x57   :  { %1164 = vmatpush3.bf16.msra.mxu0 %v1262_v26 }
  0x58   :  { %1165 = vmatprep.subr.bf16.mxu0 %v1263_v27 }
  0x5b   :  { %1166 = vmatpush3.bf16.msra.mxu0 %v1263_v27 }
  0x5c   :  { %1167 = vmatprep.subr.bf16.mxu0 %v1264_v28 }
  0x5f   :  { %1168 = vmatpush3.bf16.msra.mxu0 %v1264_v28 }
  0x62   :  { %1170 = vmatmul.mubr.bf16.vlgmr.msra.gmra.mrb[16].mxu0 %v1266_v29 }
  0xf5   :  { %v1047_v30 = vpop.f32.mrb[0].mxu0 }
  0xf6   :  { %v1048_v32 = vpop.f32.mrb[1].mxu0 }
  0xf7   :  { %v1049_v33 = vadd.f32 %v1048_v32, %v1047_v30  ;;  %v1050_v34 = vpop.f32.mrb[2].mxu0  ;;  %v1075_v35 = vpop.f32.mrb[0].mxu1 }
  0xf8   :  { %v1051_v36 = vpop.f32.mrb[3].mxu0  ;;  %v1076_v39 = vpop.f32.mrb[1].mxu1 }
  0xf9   :  { %v726_v37 = vadd.f32 %v1049_v33, %v940_v31  ;;  %v1052_v38 = vadd.f32 %v1051_v36, %v1050_v34  ;;  %v1077_v40 = vadd.f32 %v1076_v39, %v1075_v35  ;;  %v1078_v41 = vpop.f32.mrb[2].mxu1 }
  0xfa   :  { %v1079_v43 = vpop.f32.mrb[3].mxu1 }
  0xfb   :  { %v729_v42 = vadd.f32 %v1052_v38, %v940_v31  ;;  %v774_v44 = vadd.f32 %v1077_v40, %v726_v37  ;;  %v1080_v45 = vadd.f32 %v1079_v43, %v1078_v41 }
  0xfd   :  { %v777_v46 = vadd.f32 %v1080_v45, %v729_v42  ;;  %v1053_v47 = vpop.f32.mrb[4].mxu0 }
  0xfe   :  { %v1054_v48 = vpop.f32.mrb[5].mxu0 }
  0xff   :  { %v1055_v49 = vadd.f32 %v1054_v48, %v1053_v47  ;;  %v1056_v50 = vpop.f32.mrb[6].mxu0  ;;  %v1081_v53 = vpop.f32.mrb[4].mxu1 }
 0x100   :  { %v1057_v51 = vpop.f32.mrb[7].mxu0  ;;  %v1082_v54 = vpop.f32.mrb[5].mxu1 }
 0x101   :  { %v734_v52 = vadd.f32 %v1055_v49, %v940_v31  ;;  %v1083_v55 = vadd.f32 %v1082_v54, %v1081_v53  ;;  %v1084_v56 = vpop.f32.mrb[6].mxu1 }
 0x102   :  { %v1085_v57 = vpop.f32.mrb[7].mxu1 }
 0x103   :  { %v782_v58 = vadd.f32 %v1083_v55, %v734_v52 }
 0x115   :  { %v1103_v59 = vpop.f32.mrb[8].mxu0 }
 0x116   :  { %v1104_v60 = vpop.f32.mrb[9].mxu0 }
 0x117   :  { %v1105_v61 = vadd.f32 %v1104_v60, %v1103_v59  ;;  %v1106_v62 = vpop.f32.mrb[10].mxu0  ;;  %v1131_v63 = vpop.f32.mrb[8].mxu1 }
 0x118   :  { %v1107_v0 = vpop.f32.mrb[11].mxu0  ;;  %v1132_v3 = vpop.f32.mrb[9].mxu1 }
 0x119   :  { %v822_v1 = vadd.f32 %v1105_v61, %v774_v44  ;;  %v1108_v2 = vadd.f32 %v1107_v0, %v1106_v62  ;;  %v1133_v4 = vadd.f32 %v1132_v3, %v1131_v63  ;;  %v1134_v5 = vpop.f32.mrb[10].mxu1 }
 0x11a   :  { %v1135_v7 = vpop.f32.mrb[11].mxu1 }
 0x11b   :  { %v825_v6 = vadd.f32 %v1108_v2, %v777_v46  ;;  %v1136_v8 = vadd.f32 %v1135_v7, %v1134_v5  ;;  %v870_v9 = vadd.f32 %v1133_v4, %v822_v1 }
 0x11d   :  { %v1109_v10 = vpop.f32.mrb[12].mxu0  ;;  %v873_v12 = vadd.f32 %v1136_v8, %v825_v6 }
 0x11e   :  { %v1110_v11 = vpop.f32.mrb[13].mxu0 }
 0x11f   :  { %v1111_v13 = vadd.f32 %v1110_v11, %v1109_v10  ;;  %v1112_v14 = vpop.f32.mrb[14].mxu0  ;;  %v1137_v15 = vpop.f32.mrb[12].mxu1 }
 0x120   :  { %v1113_v16 = vpop.f32.mrb[15].mxu0  ;;  %v1138_v18 = vpop.f32.mrb[13].mxu1 }
 0x121   :  { %v830_v17 = vadd.f32 %v1111_v13, %v782_v58  ;;  %v1139_v19 = vadd.f32 %v1138_v18, %v1137_v15  ;;  %v1140_v20 = vpop.f32.mrb[14].mxu1 }
 0x122   :  { %v1141_v21 = vpop.f32.mrb[15].mxu1 }
 0x123   :  { %v878_v22 = vadd.f32 %v1139_v19, %v830_v17 }
 0x135   :  { %v1171_v23 = vpop.f32.mrb[16].mxu0 }
 0x136   :  { %v926_v24 = vadd.f32 %v1171_v23, %v878_v22  ;;  %v917_v25 = vpop.f32.mrb[17].mxu0 }
 0x137   :  { %v918_v26 = vadd.f32 %v917_v25, %v870_v9  ;;  %v1172_v27 = vpop.f32.mrb[18].mxu0 }
 0x138   :  { %935 = vst.msk [vmem:[%s1560_s3 + $0x10] sm:$0xf] %vm934_vm0, %v926_v24  ;;  %v920_v28 = vpop.f32.mrb[19].mxu0 }
 0x139   :  { %932 = vst.msk [vmem:[%s1560_s3] sm:$0xff] %vm931_vm1, %v918_v26  ;;  %v921_v29 = vadd.f32 %v920_v28, %v873_v12 }
 0x13b   :  { %933 = vst.msk [vmem:[%s1560_s3 + $0x8] sm:$0xff] %vm931_vm1, %v921_v29 }

</bundles_post_ra>
